<compile_context>
chip_gen: v5e
topology: v5e:2x2
jax: 0.10.0
libtpu: 0.0.40
codegen_flags: <defaults>
</compile_context>

<pallas_src>
import numpy as np
import jax
import jax.numpy as jnp
from jax.experimental import pallas as pl
from jax.experimental.pallas import tpu as pltpu


def _round_up(x, m):
    return ((x + m - 1) // m) * m


def _critic_kernel(s_ref, a_ref, w1_ref, b1_ref, w2_ref, b2_ref,
                   w3_ref, b3_ref, o_ref):
    # Fused concat: (TB, n_states) ++ (TB, n_action) -> (TB, d_in), bf16.
    x = jnp.concatenate(
        [s_ref[...].astype(jnp.bfloat16), a_ref[...].astype(jnp.bfloat16)],
        axis=1)

    # fc1: single MXU pass against the combined weight.
    h1 = jnp.dot(x, w1_ref[...], preferred_element_type=jnp.float32) + b1_ref[...]
    h1 = jnp.maximum(h1, 0.0).astype(jnp.bfloat16)

    # fc2
    h2 = jnp.dot(h1, w2_ref[...], preferred_element_type=jnp.float32) + b2_ref[...]
    h2 = jnp.maximum(h2, 0.0).astype(jnp.bfloat16)

    # fc3: N padded to 128 lanes (only column 0 is real) -> unmasked lane-dense store.
    o_ref[...] = jnp.dot(h2, w3_ref[...], preferred_element_type=jnp.float32) + b3_ref[...]


def critic_forward(state, action, params):
    """Pallas implementation of Critic.forward(state, action). Returns (B, 1)."""
    w1, b1, w2, b2, w3, b3 = params
    B = state.shape[0]
    n_states = state.shape[1]
    n_action = action.shape[1]
    d_in = n_states + n_action
    H1p = w2.shape[0]          # padded hidden1 (512)
    H2p = w2.shape[1]          # padded hidden2 (384)
    OUTP = w3.shape[1]         # padded output lanes (128)

    # Batch tile: multiple of 8 sublanes, capped at 512. For typical DDPG
    # batches (<= 512) this gives a single grid step; VMEM stays ~6-8 MiB,
    # safe on v5e/v6e (128 MiB) and v7x (64 MiB).
    TB = min(512, _round_up(B, 8))
    grid = (pl.cdiv(B, TB),)

    const2 = lambda i: (0, 0)   # weights/biases: VMEM-resident, never re-fetched
    rows = lambda i: (i, 0)     # batch-tiled activations / output

    flops = 2 * B * (d_in * H1p + H1p * H2p + H2p * OUTP)
    bytes_accessed = (
        (d_in * H1p + H1p * H2p + H2p * OUTP) * 2    # bf16 weights
        + (H1p + H2p + OUTP) * 4                     # fp32 biases
        + B * d_in * 4 + B * OUTP * 4                # inputs + (padded) output
    )

    out = pl.pallas_call(
        _critic_kernel,
        out_shape=jax.ShapeDtypeStruct((B, OUTP), jnp.float32),
        grid=grid,
        in_specs=[
            pl.BlockSpec((TB, n_states), rows),
            pl.BlockSpec((TB, n_action), rows),
            pl.BlockSpec((d_in, H1p), const2),
            pl.BlockSpec((1, H1p), const2),
            pl.BlockSpec((H1p, H2p), const2),
            pl.BlockSpec((1, H2p), const2),
            pl.BlockSpec((H2p, OUTP), const2),
            pl.BlockSpec((1, OUTP), const2),
        ],
        out_specs=pl.BlockSpec((TB, OUTP), rows),
        compiler_params=pltpu.CompilerParams(
            dimension_semantics=("parallel",),
            vmem_limit_bytes=32 << 20,
        ),
        cost_estimate=pl.CostEstimate(
            flops=flops, transcendentals=0, bytes_accessed=bytes_accessed),
    )(state.astype(jnp.float32), action.astype(jnp.float32),
      w1, b1, w2, b2, w3, b3)

    return out[:, :1]


def init_critic_params(key, n_states, n_action, n_hidden1=400, n_hidden2=300,
                       initial_w=0.003):
    """Init mirroring init_weights_biases (uniform(-1/sqrt(size[0]), +)).

    Returns (kernel_params, raw_fp32_params).
      kernel_params: transposed, zero-padded to lane multiples; fc1 weight is a
                     single combined (d_in, H1p) matrix; fc3 weight/bias padded
                     to 128 output lanes (only column 0 nonzero); weights bf16,
                     biases fp32 shaped (1, out).
      raw_fp32_params: unpadded PyTorch-layout fp32 tensors (reference check).
    """
    d_in = n_states + n_action
    ks = jax.random.split(key, 6)

    v1 = 1.0 / np.sqrt(n_hidden1)
    w1 = jax.random.uniform(ks[0], (n_hidden1, d_in), jnp.float32, -v1, v1)
    b1 = jax.random.uniform(ks[1], (n_hidden1,), jnp.float32, -v1, v1)

    v2 = 1.0 / np.sqrt(n_hidden2)
    w2 = jax.random.uniform(ks[2], (n_hidden2, n_hidden1), jnp.float32, -v2, v2)
    b2 = jax.random.uniform(ks[3], (n_hidden2,), jnp.float32, -v2, v2)

    w3 = jax.random.uniform(ks[4], (1, n_hidden2), jnp.float32, -initial_w, initial_w)
    b3 = jax.random.uniform(ks[5], (1,), jnp.float32, -initial_w, initial_w)

    # Padded sizes (lane multiples of 128). Padding is zeros everywhere, so
    # relu(0 + 0) = 0 and padded rows multiply zero activations -> math unchanged.
    H1p = _round_up(n_hidden1, 128)   # 400 -> 512
    H2p = _round_up(n_hidden2, 128)   # 300 -> 384
    OUTP = 128                        # 1   -> 128

    w1p = jnp.zeros((d_in, H1p), jnp.float32).at[:, :n_hidden1].set(w1.T)
    b1p = jnp.zeros((1, H1p), jnp.float32).at[0, :n_hidden1].set(b1)

    w2p = jnp.zeros((H1p, H2p), jnp.float32).at[:n_hidden1, :n_hidden2].set(w2.T)
    b2p = jnp.zeros((1, H2p), jnp.float32).at[0, :n_hidden2].set(b2)

    w3p = jnp.zeros((H2p, OUTP), jnp.float32).at[:n_hidden2, :1].set(w3.T)
    b3p = jnp.zeros((1, OUTP), jnp.float32).at[0, 0].set(b3[0])

    kernel_params = (
        w1p.astype(jnp.bfloat16), b1p,
        w2p.astype(jnp.bfloat16), b2p,
        w3p.astype(jnp.bfloat16), b3p,
    )
    raw_params = (w1, b1, w2, b2, w3, b3)
    return kernel_params, raw_params


def critic_forward_ref_bf16(state, action, params):
    """Bit-matching reference: same bf16 weights / fp32 accumulation as kernel."""
    w1, b1, w2, b2, w3, b3 = params
    x = jnp.concatenate([state.astype(jnp.float32), action.astype(jnp.float32)],
                        axis=1).astype(jnp.bfloat16)
    h1 = jnp.dot(x, w1, preferred_element_type=jnp.float32) + b1
    h1 = jnp.maximum(h1, 0.0).astype(jnp.bfloat16)
    h2 = jnp.dot(h1, w2, preferred_element_type=jnp.float32) + b2
    h2 = jnp.maximum(h2, 0.0).astype(jnp.bfloat16)
    out = jnp.dot(h2, w3, preferred_element_type=jnp.float32) + b3
    return out[:, :1]


def critic_forward_ref_fp32(state, action, raw_params):
    """Unpadded fp32 reference matching the PyTorch module exactly."""
    w1, b1, w2, b2, w3, b3 = raw_params
    x = jnp.concatenate([state.astype(jnp.float32), action.astype(jnp.float32)], axis=1)
    h1 = jax.nn.relu(x @ w1.T + b1)
    h2 = jax.nn.relu(h1 @ w2.T + b2)
    return h2 @ w3.T + b3


if __name__ == "__main__":
    key = jax.random.PRNGKey(0)
    k_state, k_action, k_params = jax.random.split(key, 3)

    batch = 8
    n_states = 16   # n_state = (16,)
    n_action = 4

    state = jax.random.normal(k_state, (batch, n_states), jnp.float32)
    action = jax.random.normal(k_action, (batch, n_action), jnp.float32)
    params, raw_params = init_critic_params(k_params, n_states, n_action)

    out = critic_forward(state, action, params)
    out = jax.block_until_ready(out)
    assert out.shape == (batch, 1)

    # 1) kernel vs identical bf16/fp32-acc math (tight)
    ref_bf16 = critic_forward_ref_bf16(state, action, params)
    np.testing.assert_allclose(np.asarray(out), np.asarray(ref_bf16),
                               rtol=5e-3, atol=5e-4)
    # 2) kernel vs unpadded fp32 PyTorch-equivalent math (loose, bf16 rounding)
    ref_fp32 = critic_forward_ref_fp32(state, action, raw_params)
    np.testing.assert_allclose(np.asarray(out), np.asarray(ref_fp32),
                               rtol=5e-2, atol=1e-3)

    print("KERNEL_OK")
</pallas_src>

<mosaic_0001>
module attributes {stable_mosaic.version = 11 : i64} {
  func.func @_critic_kernel(%arg0: i32, %arg1: memref<8x16xf32, #tpu.memory_space<vmem>>, %arg2: memref<8x4xf32, #tpu.memory_space<vmem>>, %arg3: memref<20x512xbf16, #tpu.memory_space<vmem>>, %arg4: memref<1x512xf32, #tpu.memory_space<vmem>>, %arg5: memref<512x384xbf16, #tpu.memory_space<vmem>>, %arg6: memref<1x384xf32, #tpu.memory_space<vmem>>, %arg7: memref<384x128xbf16, #tpu.memory_space<vmem>>, %arg8: memref<1x128xf32, #tpu.memory_space<vmem>>, %arg9: memref<8x128xf32, #tpu.memory_space<vmem>>) attributes {dimension_semantics = [#tpu.dimension_semantics<parallel>], iteration_bounds = array<i64: 1>, scalar_prefetch = 0 : i64, scratch_operands = 0 : i64, tpu.core_type = #tpu.core_type<tc>, window_params = [{transform_indices = @transform_0, window_bounds = array<i64: 8, 16>}, {transform_indices = @transform_1, window_bounds = array<i64: 8, 4>}, {pipeline_mode = #tpu.pipeline_mode<synchronous>, transform_indices = @transform_2, window_bounds = array<i64: 20, 512>}, {pipeline_mode = #tpu.pipeline_mode<synchronous>, transform_indices = @transform_3, window_bounds = array<i64: 1, 512>}, {pipeline_mode = #tpu.pipeline_mode<synchronous>, transform_indices = @transform_4, window_bounds = array<i64: 512, 384>}, {pipeline_mode = #tpu.pipeline_mode<synchronous>, transform_indices = @transform_5, window_bounds = array<i64: 1, 384>}, {pipeline_mode = #tpu.pipeline_mode<synchronous>, transform_indices = @transform_6, window_bounds = array<i64: 384, 128>}, {pipeline_mode = #tpu.pipeline_mode<synchronous>, transform_indices = @transform_7, window_bounds = array<i64: 1, 128>}, {transform_indices = @transform_8, window_bounds = array<i64: 8, 128>}]} {
    %c0 = arith.constant 0 : index
    %c0_0 = arith.constant 0 : index
    %0 = vector.load %arg1[%c0, %c0_0] : memref<8x16xf32, #tpu.memory_space<vmem>>, vector<8x16xf32>
    %1 = arith.truncf %0 : vector<8x16xf32> to vector<8x16xbf16>
    %c0_1 = arith.constant 0 : index
    %c0_2 = arith.constant 0 : index
    %2 = vector.load %arg2[%c0_1, %c0_2] : memref<8x4xf32, #tpu.memory_space<vmem>>, vector<8x4xf32>
    %3 = arith.truncf %2 : vector<8x4xf32> to vector<8x4xbf16>
    %4 = tpu.concatenate %1, %3 in 1 : vector<8x16xbf16>, vector<8x4xbf16> -> vector<8x20xbf16>
    %c0_3 = arith.constant 0 : index
    %c0_4 = arith.constant 0 : index
    %5 = vector.load %arg3[%c0_3, %c0_4] : memref<20x512xbf16, #tpu.memory_space<vmem>>, vector<20x512xbf16>
    %cst = arith.constant dense<0.000000e+00> : vector<8x512xf32>
    %6 = tpu.matmul %4, %5, %cst {dimension_numbers = #tpu.dot_dimension_numbers<[1], [0], [0], [1], [0, 0, 1, 1], [], []>} : vector<8x20xbf16>, vector<20x512xbf16>, vector<8x512xf32> -> vector<8x512xf32>
    %c0_5 = arith.constant 0 : index
    %c0_6 = arith.constant 0 : index
    %7 = vector.load %arg4[%c0_5, %c0_6] : memref<1x512xf32, #tpu.memory_space<vmem>>, vector<1x512xf32>
    %8 = vector.broadcast %7 : vector<1x512xf32> to vector<8x512xf32>
    %9 = arith.addf %6, %8 : vector<8x512xf32>
    %cst_7 = arith.constant 0.000000e+00 : f32
    %10 = vector.broadcast %cst_7 : f32 to vector<8x512xf32>
    %11 = arith.maximumf %9, %10 : vector<8x512xf32>
    %12 = arith.truncf %11 : vector<8x512xf32> to vector<8x512xbf16>
    %c0_8 = arith.constant 0 : index
    %c0_9 = arith.constant 0 : index
    %13 = vector.load %arg5[%c0_8, %c0_9] : memref<512x384xbf16, #tpu.memory_space<vmem>>, vector<512x384xbf16>
    %cst_10 = arith.constant dense<0.000000e+00> : vector<8x384xf32>
    %14 = tpu.matmul %12, %13, %cst_10 {dimension_numbers = #tpu.dot_dimension_numbers<[1], [0], [0], [1], [0, 0, 1, 1], [], []>} : vector<8x512xbf16>, vector<512x384xbf16>, vector<8x384xf32> -> vector<8x384xf32>
    %c0_11 = arith.constant 0 : index
    %c0_12 = arith.constant 0 : index
    %15 = vector.load %arg6[%c0_11, %c0_12] : memref<1x384xf32, #tpu.memory_space<vmem>>, vector<1x384xf32>
    %16 = vector.broadcast %15 : vector<1x384xf32> to vector<8x384xf32>
    %17 = arith.addf %14, %16 : vector<8x384xf32>
    %cst_13 = arith.constant 0.000000e+00 : f32
    %18 = vector.broadcast %cst_13 : f32 to vector<8x384xf32>
    %19 = arith.maximumf %17, %18 : vector<8x384xf32>
    %20 = arith.truncf %19 : vector<8x384xf32> to vector<8x384xbf16>
    %c0_14 = arith.constant 0 : index
    %c0_15 = arith.constant 0 : index
    %21 = vector.load %arg7[%c0_14, %c0_15] : memref<384x128xbf16, #tpu.memory_space<vmem>>, vector<384x128xbf16>
    %cst_16 = arith.constant dense<0.000000e+00> : vector<8x128xf32>
    %22 = tpu.matmul %20, %21, %cst_16 {dimension_numbers = #tpu.dot_dimension_numbers<[1], [0], [0], [1], [0, 0, 1, 1], [], []>} : vector<8x384xbf16>, vector<384x128xbf16>, vector<8x128xf32> -> vector<8x128xf32>
    %c0_17 = arith.constant 0 : index
    %c0_18 = arith.constant 0 : index
    %23 = vector.load %arg8[%c0_17, %c0_18] : memref<1x128xf32, #tpu.memory_space<vmem>>, vector<1x128xf32>
    %24 = vector.broadcast %23 : vector<1x128xf32> to vector<8x128xf32>
    %25 = arith.addf %22, %24 : vector<8x128xf32>
    %c0_19 = arith.constant 0 : index
    %c0_20 = arith.constant 0 : index
    %26 = vector.load %arg9[%c0_19, %c0_20] : memref<8x128xf32, #tpu.memory_space<vmem>>, vector<8x128xf32>
    tpu.vector_store %arg9[%c0_19, %c0_20], %25 {strides = array<i32>} : memref<8x128xf32, #tpu.memory_space<vmem>>, vector<8x128xf32>,
    return
  }
  func.func @transform_0(%arg0: i32) -> (i32, i32) {
    %c0_i32 = arith.constant 0 : i32
    %c0_i32_0 = arith.constant 0 : i32
    return %arg0, %c0_i32 : i32, i32
  }
  func.func @transform_1(%arg0: i32) -> (i32, i32) {
    %c0_i32 = arith.constant 0 : i32
    %c0_i32_0 = arith.constant 0 : i32
    return %arg0, %c0_i32 : i32, i32
  }
  func.func @transform_2(%arg0: i32) -> (i32, i32) {
    %c0_i32 = arith.constant 0 : i32
    %c0_i32_0 = arith.constant 0 : i32
    %c0_i32_1 = arith.constant 0 : i32
    return %c0_i32, %c0_i32_0 : i32, i32
  }
  func.func @transform_3(%arg0: i32) -> (i32, i32) {
    %c0_i32 = arith.constant 0 : i32
    %c0_i32_0 = arith.constant 0 : i32
    %c0_i32_1 = arith.constant 0 : i32
    return %c0_i32, %c0_i32_0 : i32, i32
  }
  func.func @transform_4(%arg0: i32) -> (i32, i32) {
    %c0_i32 = arith.constant 0 : i32
    %c0_i32_0 = arith.constant 0 : i32
    %c0_i32_1 = arith.constant 0 : i32
    return %c0_i32, %c0_i32_0 : i32, i32
  }
  func.func @transform_5(%arg0: i32) -> (i32, i32) {
    %c0_i32 = arith.constant 0 : i32
    %c0_i32_0 = arith.constant 0 : i32
    %c0_i32_1 = arith.constant 0 : i32
    return %c0_i32, %c0_i32_0 : i32, i32
  }
  func.func @transform_6(%arg0: i32) -> (i32, i32) {
    %c0_i32 = arith.constant 0 : i32
    %c0_i32_0 = arith.constant 0 : i32
    %c0_i32_1 = arith.constant 0 : i32
    return %c0_i32, %c0_i32_0 : i32, i32
  }
  func.func @transform_7(%arg0: i32) -> (i32, i32) {
    %c0_i32 = arith.constant 0 : i32
    %c0_i32_0 = arith.constant 0 : i32
    %c0_i32_1 = arith.constant 0 : i32
    return %c0_i32, %c0_i32_0 : i32, i32
  }
  func.func @transform_8(%arg0: i32) -> (i32, i32) {
    %c0_i32 = arith.constant 0 : i32
    %c0_i32_0 = arith.constant 0 : i32
    return %arg0, %c0_i32 : i32, i32
  }
}

</mosaic_0001>

<bundles_post_ra>
// kernel: tpu_custom_call.1
= control target key start
LH: loop header
LB: loop body
LE: loop exit
PB: predicated region body
PF: predicated region fallthrough
CT: control target
= control target key end

     0   :  { %13 = vsyncpa [#allocation3], 0  ;;  %s2138_s0 = inlined_call_operand.vmem [shape: f32[8,16], index: 0, kind: input, shape index: {}]   ;;  %s2139_s1 = inlined_call_operand.vmem [shape: f32[8,4], index: 1, kind: input, shape index: {}]   ;;  %s2140_s2 = inlined_call_operand.hbm [shape: bf16[20,512], index: 2, kind: input, shape index: {}]   ;;  %s2141_s3 = inlined_call_operand.vmem [shape: f32[1,512], index: 3, kind: input, shape index: {}]   ;;  %s2142_s4 = inlined_call_operand.hbm [shape: bf16[512,384], index: 4, kind: input, shape index: {}]   ;;  %s2143_s5 = inlined_call_operand.vmem [shape: f32[1,384], index: 5, kind: input, shape index: {}]   ;;  %s2144_s6 = inlined_call_operand.hbm [shape: bf16[384,128], index: 6, kind: input, shape index: {}]   ;;  %s2145_s7 = inlined_call_operand.vmem [shape: f32[1,128], index: 7, kind: input, shape index: {}]   ;;  %s2146_s8 = inlined_call_operand.hbm [shape: f32[8,128], index: 8, kind: output, shape index: {}]  }
   0x1   :  { %14 = vsyncpa [#allocation6], 0  ;;  %s39_s29 = sshll.u32 %s2142_s4, 4  ;;  %s40_s29 = int_to_ptr.hbm [resolvable:$true] %s39_s29 }
   0x2   :  { %15 = vsyncpa [#allocation4], 0  ;;  %s2014_s30 = smov [#allocation5]   ;;  %s24_s12 = sshll.u32 %s2140_s2, 4  ;;  %s25_s12 = int_to_ptr.hbm [resolvable:$true] %s24_s12 }
   0x3   :  { %s41_s9 = sshll.u32 %s2014_s30, 4  ;;  %s2015_s13 = smov 192   ;;  %s42_s9 = int_to_ptr.vmem [resolvable:$true] %s41_s9 }
   0x4   :  { %s2016_s14 = smov 12   ;;  %s2017_s15 = smov [#allocation2]  }
   0x5   :  { %47 = dma.hbm_to_vmem [thread:$0]  %s40_s29, 12288, %s42_s9, [#allocation6], %s2015_s13, %s2015_s13, %s2016_s14  }
   0x6   :  { %s26_s16 = sshll.u32 %s2017_s15, 4  ;;  %s2018_s17 = smov 256   ;;  %s27_s16 = int_to_ptr.vmem [resolvable:$true] %s26_s16 }
   0x7   :  { %s2019_s18 = smov 16   ;;  %s54_s20 = sshll.u32 %s2144_s6, 4  ;;  %s55_s20 = int_to_ptr.hbm [resolvable:$true] %s54_s20 }
   0x8   :  { %32 = dma.hbm_to_vmem [thread:$0]  %s25_s12, 768, %s27_s16, [#allocation3], %s2018_s17, %s2018_s17, %s2019_s18  }
   0x9   :  { %s2020_s21 = smov [#allocation7]   ;;  %s2021_s2 = smov 64  }
   0xa   :  { %s56_s22 = sshll.u32 %s2020_s21, 4  ;;  %s2022_s23 = smov 4   ;;  %s57_s22 = int_to_ptr.vmem [resolvable:$true] %s56_s22 }
   0xb   :  { %62 = dma.hbm_to_vmem [thread:$0]  %s55_s20, 3072, %s57_s22, [#allocation6], %s2021_s2, %s2021_s2, %s2022_s23  }
   0xc   :  { %2008 = dma.done.wait [#allocation3], 768  }
   0xd   :  { %2009 = vsyncadd [#allocation3], 4294966528 }
   0xe   :  { %2010 = dma.done.wait [#allocation6], 15360  }
   0xf   :  { %2011 = vsyncadd [#allocation6], 4294951936  ;;  %v80_v0 = vld [vmem:[%s2139_s1] sm:$0xff]  ;;  %v96_v2 = vld [vmem:[#allocation2 + $0x28] sm:$0x33]  ;;  %vm140_vm0 = vcmask 1041408  }
  0x10   :  { %v95_v1 = vld [vmem:[#allocation2 + $0x20] sm:$0x33]  ;;  %v81_v3 = vpack.c.bf16 %v80_v0, %v80_v0  ;;  %v123_v6 = vunpack.c.l.b16 %v96_v2  ;;  %v1779_v8 = vld [vmem:[#allocation2 + $0xc] sm:$0xf0]  ;;  %v1281_v14 = vld [vmem:[#allocation2 + $0x10] sm:$0xf0]  ;;  %v124_v24 = vunpack.c.h.b16 %v96_v2 }
  0x11   :  { %v121_v4 = vunpack.c.l.b16 %v95_v1  ;;  %v122_v5 = vunpack.c.h.b16 %v95_v1  ;;  %v1279_v7 = vld [vmem:[#allocation2] sm:$0xf]  ;;  %v1777_v13 = vld [vmem:[#allocation2 + $0x4] sm:$0xf]  ;;  %v1287_v15 = vld [vmem:[#allocation2 + $0x8] sm:$0xf] }
  0x12   :  { %v83_v9 = vunpack.c.l.b16 %v81_v3  ;;  %v131_v12 = vpack.c.b16 %v123_v6, %v123_v6  ;;  %v1780_v16 = vld [vmem:[#allocation2 + $0x14] sm:$0xf0]  ;;  %v1280_v21 = vor.u32 %v1779_v8, %v1279_v7  ;;  %v1284_v22 = vor.u32 %v1777_v13, %v1281_v14  ;;  %v1778_v26 = vld [vmem:[#allocation2 + $0xc] sm:$0xf]  ;;  %v1289_v27 = vld [vmem:[#allocation2 + $0x18] sm:$0xf0] }
  0x13   :  { %v129_v10 = vpack.c.b16 %v121_v4, %v121_v4  ;;  %v130_v11 = vpack.c.b16 %v122_v5, %v122_v5  ;;  %v1288_v23 = vor.u32 %v1780_v16, %v1287_v15  ;;  %v132_v25 = vpack.c.b16 %v124_v24, %v124_v24  ;;  %v1479_v30 = vld [vmem:[#allocation5 + $0x168] sm:$0xf]  ;;  %v1827_v31 = vld [vmem:[#allocation5 + $0x170] sm:$0xf0]  ;;  %v1467_v32 = vld [vmem:[#allocation5 + $0x150] sm:$0xf] }
  0x14   :  { %v84_v17 = vpack.c.b16 %v83_v9, %v83_v9  ;;  %v148_v20 = vsel %vm140_vm0, %v131_v12, 0  ;;  %v1292_v29 = vor.u32 %v1778_v26, %v1289_v27  ;;  %v1480_v33 = vor.u32 %v1827_v31, %v1479_v30  ;;  %v1824_v34 = vld [vmem:[#allocation5 + $0x158] sm:$0xf0]  ;;  %v1383_v35 = vld [vmem:[#allocation5 + $0xa8] sm:$0xf]  ;;  %v78_v55 = vld [vmem:[%s2138_s0] sm:$0xff] }
  0x15   :  { %v142_v18 = vsel %vm140_vm0, %v129_v10, 0  ;;  %v145_v19 = vsel %vm140_vm0, %v130_v11, 0  ;;  %185 = vmatpush.bf16.msra.mxu2 %v148_v20  ;;  %v151_v28 = vsel %vm140_vm0, %v132_v25, 0  ;;  %v1803_v36 = vld [vmem:[#allocation5 + $0xb0] sm:$0xf0]  ;;  %v1468_v40 = vor.u32 %v1824_v34, %v1467_v32  ;;  %s2023_s29 = smov [#allocation8]  }
  0x16   :  { %159 = vmatpush.bf16.msra.mxu3 %v142_v18  ;;  %172 = vmatpush.bf16.msra.mxu1 %v145_v19  ;;  %v1384_v37 = vor.u32 %v1803_v36, %v1383_v35  ;;  %v1575_v38 = vld [vmem:[#allocation5 + $0x228] sm:$0xf]  ;;  %v1851_v39 = vld [vmem:[#allocation5 + $0x230] sm:$0xf0]  ;;  %v1455_v42 = vld [vmem:[#allocation5 + $0x138] sm:$0xf]  ;;  %v79_v63 = vpack.c.bf16 %v78_v55, %v78_v55 }
  0x17   :  { %85 = vrot.lane.b32.xlu0 %v84_v17, %s2019_s18  ;;  %v1576_v41 = vor.u32 %v1851_v39, %v1575_v38  ;;  %v1371_v43 = vld [vmem:[#allocation5 + $0x90] sm:$0xf]  ;;  %v1800_v44 = vld [vmem:[#allocation5 + $0x98] sm:$0xf0]  ;;  %v1821_v45 = vld [vmem:[#allocation5 + $0x140] sm:$0xf0] }
  0x18   :  { %861 = vmatpush.bf16.msra.mxu0 %v1384_v37  ;;  %v1372_v46 = vor.u32 %v1800_v44, %v1371_v43  ;;  %v1563_v47 = vld [vmem:[#allocation5 + $0x210] sm:$0xf]  ;;  %v1848_v48 = vld [vmem:[#allocation5 + $0x218] sm:$0xf0]  ;;  %v1359_v50 = vld [vmem:[#allocation5 + $0x78] sm:$0xf]  ;;  %v1456_v54 = vor.u32 %v1821_v45, %v1455_v42 }
  0x19   :  { %186 = vmatpush.bf16.msra.mxu2 %v1288_v23  ;;  %v1564_v49 = vor.u32 %v1848_v48, %v1563_v47  ;;  %v1797_v51 = vld [vmem:[#allocation5 + $0x80] sm:$0xf0]  ;;  %v1551_v52 = vld [vmem:[#allocation5 + $0x1f8] sm:$0xf]  ;;  %v1443_v56 = vld [vmem:[#allocation5 + $0x120] sm:$0xf] }
  0x1a   :  { %160 = vmatpush.bf16.msra.mxu3 %v1280_v21  ;;  %173 = vmatpush.bf16.msra.mxu1 %v1284_v22  ;;  %v1845_v53 = vld [vmem:[#allocation5 + $0x200] sm:$0xf0]  ;;  %v1818_v57 = vld [vmem:[#allocation5 + $0x128] sm:$0xf0]  ;;  %v1360_v58 = vor.u32 %v1797_v51, %v1359_v50  ;;  %v1347_v60 = vld [vmem:[#allocation5 + $0x60] sm:$0xf] }
  0x1b   :  { %v1552_v59 = vor.u32 %v1845_v53, %v1551_v52  ;;  %v1794_v61 = vld [vmem:[#allocation5 + $0x68] sm:$0xf0]  ;;  %v1539_v62 = vld [vmem:[#allocation5 + $0x1e0] sm:$0xf]  ;;  %v1444_v0 = vor.u32 %v1818_v57, %v1443_v56  ;;  %v1671_v2 = vld [vmem:[#allocation5 + $0x2e8] sm:$0xf] }
  0x1c   :  { %862 = vmatpush.bf16.msra.mxu0 %v1372_v46  ;;  %v1842_v1 = vld [vmem:[#allocation5 + $0x1e8] sm:$0xf0]  ;;  %v1875_v3 = vld [vmem:[#allocation5 + $0x2f0] sm:$0xf0]  ;;  %vm87_vm1 = vcmask 130048   ;;  %vm137_vm2 = vcmask 162816   ;;  %v1348_v6 = vor.u32 %v1794_v61, %v1347_v60 }
  0x1d   :  { %887 = vmatpush.bf16.msrb.mxu2 %v1576_v41  ;;  %v1431_v4 = vld [vmem:[#allocation5 + $0x108] sm:$0xf]  ;;  %v1815_v5 = vld [vmem:[#allocation5 + $0x110] sm:$0xf0]  ;;  %v1540_v8 = vor.u32 %v1842_v1, %v1539_v62  ;;  %v1672_v12 = vor.u32 %v1875_v3, %v1671_v2  ;;  %v1659_v16 = vld [vmem:[#allocation5 + $0x2d0] sm:$0xf] }
  0x1e   :  { %198 = vmatpush.bf16.msrb.mxu3 %v151_v28  ;;  %874 = vmatpush.bf16.msrb.mxu1 %v1480_v33  ;;  %v1335_v9 = vld [vmem:[#allocation5 + $0x48] sm:$0xf]  ;;  %v1791_v10 = vld [vmem:[#allocation5 + $0x50] sm:$0xf0]  ;;  %v1432_v14 = vor.u32 %v1815_v5, %v1431_v4  ;;  %v1872_v17 = vld [vmem:[#allocation5 + $0x2d8] sm:$0xf0] }
  0x1f   :  { %v1527_v11 = vld [vmem:[#allocation5 + $0x1c8] sm:$0xf]  ;;  %v1839_v15 = vld [vmem:[#allocation5 + $0x1d0] sm:$0xf0]  ;;  %v1419_v18 = vld [vmem:[#allocation5 + $0xf0] sm:$0xf]  ;;  %v1336_v20 = vor.u32 %v1791_v10, %v1335_v9  ;;  %v1660_v25 = vor.u32 %v1872_v17, %v1659_v16 }
  0x20   :  { %863 = vmatpush.bf16.msra.mxu0 %v1360_v58  ;;  %v1812_v19 = vld [vmem:[#allocation5 + $0xf8] sm:$0xf0]  ;;  %v1528_v21 = vor.u32 %v1839_v15, %v1527_v11  ;;  %v1323_v22 = vld [vmem:[#allocation5 + $0x30] sm:$0xf]  ;;  %v1647_v28 = vld [vmem:[#allocation5 + $0x2b8] sm:$0xf] }
  0x21   :  { %888 = vmatpush.bf16.msrb.mxu2 %v1564_v49  ;;  %v1788_v23 = vld [vmem:[#allocation5 + $0x38] sm:$0xf0]  ;;  %v1515_v24 = vld [vmem:[#allocation5 + $0x1b0] sm:$0xf]  ;;  %v1420_v26 = vor.u32 %v1812_v19, %v1419_v18  ;;  %v1407_v30 = vld [vmem:[#allocation5 + $0xd8] sm:$0xf] }
  0x22   :  { %199 = vmatpush.bf16.msrb.mxu3 %v1292_v29  ;;  %875 = vmatpush.bf16.msrb.mxu1 %v1468_v40  ;;  %v1836_v27 = vld [vmem:[#allocation5 + $0x1b8] sm:$0xf0]  ;;  %v1869_v29 = vld [vmem:[#allocation5 + $0x2c0] sm:$0xf0]  ;;  %v1324_v32 = vor.u32 %v1788_v23, %v1323_v22  ;;  %v1311_v34 = vld [vmem:[#allocation5 + $0x18] sm:$0xf] }
  0x23   :  { %v1809_v31 = vld [vmem:[#allocation5 + $0xe0] sm:$0xf0]  ;;  %v1516_v33 = vor.u32 %v1836_v27, %v1515_v24  ;;  %v1503_v36 = vld [vmem:[#allocation5 + $0x198] sm:$0xf]  ;;  %v1648_v37 = vor.u32 %v1869_v29, %v1647_v28  ;;  %v1635_v40 = vld [vmem:[#allocation5 + $0x2a0] sm:$0xf] }
  0x24   :  { %864 = vmatpush.bf16.msra.mxu0 %v1348_v6  ;;  %v1785_v35 = vld [vmem:[#allocation5 + $0x20] sm:$0xf0]  ;;  %v1408_v38 = vor.u32 %v1809_v31, %v1407_v30  ;;  %v1866_v41 = vld [vmem:[#allocation5 + $0x2a8] sm:$0xf0]  ;;  %v1395_v42 = vld [vmem:[#allocation5 + $0xc0] sm:$0xf] }
  0x25   :  { %889 = vmatpush.bf16.msrb.mxu2 %v1552_v59  ;;  %v1833_v39 = vld [vmem:[#allocation5 + $0x1a0] sm:$0xf0]  ;;  %v1806_v43 = vld [vmem:[#allocation5 + $0xc8] sm:$0xf0]  ;;  %v1481_v45 = vld [vmem:[#allocation5 + $0x174] sm:$0xf0]  ;;  %v1312_v46 = vor.u32 %v1785_v35, %v1311_v34  ;;  %v1636_v52 = vor.u32 %v1866_v41, %v1635_v40 }
  0x26   :  { %876 = vmatpush.bf16.msrb.mxu1 %v1456_v54  ;;  %v1826_v44 = vld [vmem:[#allocation5 + $0x16c] sm:$0xf]  ;;  %v1299_v47 = vld [vmem:[#allocation5] sm:$0xf]  ;;  %v1504_v48 = vor.u32 %v1833_v39, %v1503_v36  ;;  %v1396_v53 = vor.u32 %v1806_v43, %v1395_v42  ;;  %v1385_v55 = vld [vmem:[#allocation5 + $0xb4] sm:$0xf0] }
  0x27   :  { %v1782_v49 = vld [vmem:[#allocation5 + $0x8] sm:$0xf0]  ;;  %v1491_v50 = vld [vmem:[#allocation5 + $0x180] sm:$0xf]  ;;  %v1484_v57 = vor.u32 %v1826_v44, %v1481_v45  ;;  %v1577_v58 = vld [vmem:[#allocation5 + $0x234] sm:$0xf0] }
  0x28   :  { %865 = vmatpush.bf16.msra.mxu0 %v1336_v20  ;;  %v1830_v51 = vld [vmem:[#allocation5 + $0x188] sm:$0xf0]  ;;  %v1623_v59 = vld [vmem:[#allocation5 + $0x288] sm:$0xf]  ;;  %v1863_v60 = vld [vmem:[#allocation5 + $0x290] sm:$0xf0] }
  0x29   :  { %890 = vmatpush.bf16.msrb.mxu2 %v1540_v8  ;;  %v1802_v54 = vld [vmem:[#allocation5 + $0xac] sm:$0xf]  ;;  %v1823_v61 = vld [vmem:[#allocation5 + $0x154] sm:$0xf]  ;;  %v1469_v62 = vld [vmem:[#allocation5 + $0x15c] sm:$0xf0]  ;;  %v1624_v3 = vor.u32 %v1863_v60, %v1623_v59 }
  0x2a   :  { %877 = vmatpush.bf16.msrb.mxu1 %v1444_v0  ;;  %v1850_v56 = vld [vmem:[#allocation5 + $0x22c] sm:$0xf]  ;;  %v1492_v0 = vor.u32 %v1830_v51, %v1491_v50  ;;  %v1388_v1 = vor.u32 %v1802_v54, %v1385_v55  ;;  %v1799_v4 = vld [vmem:[#allocation5 + $0x94] sm:$0xf]  ;;  %v1373_v5 = vld [vmem:[#allocation5 + $0x9c] sm:$0xf0] }
  0x2b   :  { %v1580_v2 = vor.u32 %v1850_v56, %v1577_v58  ;;  %v1847_v6 = vld [vmem:[#allocation5 + $0x214] sm:$0xf]  ;;  %v1565_v8 = vld [vmem:[#allocation5 + $0x21c] sm:$0xf0]  ;;  %v1611_v9 = vld [vmem:[#allocation5 + $0x270] sm:$0xf] }
  0x2c   :  { %866 = vmatpush.bf16.msra.mxu0 %v1324_v32  ;;  %v1860_v10 = vld [vmem:[#allocation5 + $0x278] sm:$0xf0]  ;;  %v1568_v15 = vor.u32 %v1847_v6, %v1565_v8  ;;  %v1361_v18 = vld [vmem:[#allocation5 + $0x84] sm:$0xf0]  ;;  %v1857_v22 = vld [vmem:[#allocation5 + $0x260] sm:$0xf0] }
  0x2d   :  { %891 = vmatpush.bf16.msrb.mxu2 %v1528_v21  ;;  %v1820_v11 = vld [vmem:[#allocation5 + $0x13c] sm:$0xf]  ;;  %v1612_v16 = vor.u32 %v1860_v10, %v1611_v9  ;;  %v1553_v20 = vld [vmem:[#allocation5 + $0x204] sm:$0xf0]  ;;  %v1599_v21 = vld [vmem:[#allocation5 + $0x258] sm:$0xf] }
  0x2e   :  { %878 = vmatpush.bf16.msrb.mxu1 %v1432_v14  ;;  %v1376_v14 = vor.u32 %v1799_v4, %v1373_v5  ;;  %v1796_v17 = vld [vmem:[#allocation5 + $0x7c] sm:$0xf]  ;;  %v1817_v23 = vld [vmem:[#allocation5 + $0x124] sm:$0xf]  ;;  %v1445_v24 = vld [vmem:[#allocation5 + $0x12c] sm:$0xf0]  ;;  %v1600_v27 = vor.u32 %v1857_v22, %v1599_v21 }
  0x2f   :  { %v1844_v19 = vld [vmem:[#allocation5 + $0x1fc] sm:$0xf]  ;;  %v1793_v28 = vld [vmem:[#allocation5 + $0x64] sm:$0xf]  ;;  %v1349_v29 = vld [vmem:[#allocation5 + $0x6c] sm:$0xf0]  ;;  %v1448_v30 = vor.u32 %v1817_v23, %v1445_v24 }
  0x30   :  { %867 = vmatpush.bf16.msra.mxu0 %v1312_v46  ;;  %v1841_v31 = vld [vmem:[#allocation5 + $0x1e4] sm:$0xf]  ;;  %v1541_v32 = vld [vmem:[#allocation5 + $0x1ec] sm:$0xf0]  ;;  %v1433_v34 = vld [vmem:[#allocation5 + $0x114] sm:$0xf0]  ;;  %v1352_v35 = vor.u32 %v1793_v28, %v1349_v29 }
  0x31   :  { %892 = vmatpush.bf16.msrb.mxu2 %v1516_v33  ;;  %v1814_v33 = vld [vmem:[#allocation5 + $0x10c] sm:$0xf]  ;;  %v1544_v36 = vor.u32 %v1841_v31, %v1541_v32  ;;  %v1421_v39 = vld [vmem:[#allocation5 + $0xfc] sm:$0xf0]  ;;  %v1337_v45 = vld [vmem:[#allocation5 + $0x54] sm:$0xf0] }
  0x32   :  { %879 = vmatpush.bf16.msrb.mxu1 %v1420_v26  ;;  %v1556_v26 = vor.u32 %v1844_v19, %v1553_v20  ;;  %v1587_v41 = vld [vmem:[#allocation5 + $0x240] sm:$0xf]  ;;  %v1854_v42 = vld [vmem:[#allocation5 + $0x248] sm:$0xf0]  ;;  %v1673_v50 = vld [vmem:[#allocation5 + $0x2f4] sm:$0xf0] }
  0x33   :  { %v1588_v43 = vor.u32 %v1854_v42, %v1587_v41  ;;  %v1790_v44 = vld [vmem:[#allocation5 + $0x4c] sm:$0xf]  ;;  %v1409_v54 = vld [vmem:[#allocation5 + $0xe4] sm:$0xf0]  ;;  %v1787_v56 = vld [vmem:[#allocation5 + $0x34] sm:$0xf] }
  0x34   :  { %v1838_v46 = vld [vmem:[#allocation5 + $0x1cc] sm:$0xf]  ;;  %v1835_v58 = vld [vmem:[#allocation5 + $0x1b4] sm:$0xf]  ;;  %v1517_v60 = vld [vmem:[#allocation5 + $0x1bc] sm:$0xf0] }
  0x35   :  { %893 = vmatpush.bf16.msrb.mxu2 %v1504_v48  ;;  %v1529_v48 = vld [vmem:[#allocation5 + $0x1d4] sm:$0xf0]  ;;  %v1784_v4 = vld [vmem:[#allocation5 + $0x1c] sm:$0xf]  ;;  %v1313_v5 = vld [vmem:[#allocation5 + $0x24] sm:$0xf0] }
  0x36   :  { %880 = vmatpush.bf16.msrb.mxu1 %v1408_v38  ;;  %v1811_v38 = vld [vmem:[#allocation5 + $0xf4] sm:$0xf]  ;;  %v1532_v51 = vor.u32 %v1838_v46, %v1529_v48  ;;  %v1832_v6 = vld [vmem:[#allocation5 + $0x19c] sm:$0xf]  ;;  %v1505_v8 = vld [vmem:[#allocation5 + $0x1a4] sm:$0xf0] }
  0x37   :  { %v1424_v40 = vor.u32 %v1811_v38, %v1421_v39  ;;  %v1868_v9 = vld [vmem:[#allocation5 + $0x2bc] sm:$0xf]  ;;  %v1649_v10 = vld [vmem:[#allocation5 + $0x2c4] sm:$0xf0]  ;;  %v1865_v19 = vld [vmem:[#allocation5 + $0x2a4] sm:$0xf] }
  0x38   :  { %v1862_v22 = vld [vmem:[#allocation5 + $0x28c] sm:$0xf]  ;;  %v1625_v23 = vld [vmem:[#allocation5 + $0x294] sm:$0xf0]  ;;  %v1856_v28 = vld [vmem:[#allocation5 + $0x25c] sm:$0xf] }
  0x39   :  { %894 = vmatpush.bf16.msrb.mxu2 %v1492_v0  ;;  %v1628_v24 = vor.u32 %v1862_v22, %v1625_v23  ;;  %v1601_v29 = vld [vmem:[#allocation5 + $0x264] sm:$0xf0]  ;;  %v2103_v31 = vld [vmem:[%s2141_s3] sm:$0xf]  ;;  %v1853_v32 = vld [vmem:[#allocation5 + $0x244] sm:$0xf] }
  0x3a   :  { %881 = vmatpush.bf16.msrb.mxu1 %v1396_v53  ;;  %v1808_v53 = vld [vmem:[#allocation5 + $0xdc] sm:$0xf]  ;;  %v1487_v38 = vld [vmem:[#allocation5 + $0x170] sm:$0xf]  ;;  %v99_v41 = vperm.slane %v2103_v31, 0  ;;  %v101_v42 = vperm.slane %v2103_v31, 2 }
  0x3b   :  { %v1412_v55 = vor.u32 %v1808_v53, %v1409_v54  ;;  %v1828_v39 = vld [vmem:[#allocation5 + $0x178] sm:$0xf0]  ;;  %v1825_v46 = vld [vmem:[#allocation5 + $0x160] sm:$0xf0]  ;;  %v1355_v22 = vld [vmem:[#allocation5 + $0x68] sm:$0xf] }
  0x3c   :  { %v1795_v23 = vld [vmem:[#allocation5 + $0x70] sm:$0xf0]  ;;  %s1264_s30 = sshll.u32 %s2023_s29, 4  ;;  %s1266_s11 = sshll.u32 %s2146_s8, 4  ;;  %s1265_s30 = int_to_ptr.vmem [resolvable:$true] %s1264_s30  ;;  %s1267_s11 = int_to_ptr.hbm [resolvable:$true] %s1266_s11 }
  0x89   :  { %v86_v7 = vpop.permute.xlu0 %85 }
  0x8a   :  { %v2090_v13 = vsel %vm87_vm1, %v79_v63, %v86_v7  ;;  %v1300_v63 = vor.u32 %v1782_v49, %v1299_v47  ;;  %v1472_v7 = vor.u32 %v1823_v61, %v1469_v62  ;;  %v1340_v47 = vor.u32 %v1790_v44, %v1337_v45  ;;  %v1874_v49 = vld [vmem:[#allocation5 + $0x2ec] sm:$0xf]  ;;  %v1871_v61 = vld [vmem:[#allocation5 + $0x2d4] sm:$0xf]  ;;  %v1661_v62 = vld [vmem:[#allocation5 + $0x2dc] sm:$0xf0] }
  0x8b   :  { %1293 = vmatmul.msk.bf16.vlgmr.msra.gmra.mxu3 %vm137_vm2, %v2090_v13  ;;  %1294 = vmatmul.msk.bf16.vlgmr.msra.gmra.mxu1 %vm137_vm2, %v2090_v13  ;;  %v1664_v0 = vor.u32 %v1871_v61, %v1661_v62  ;;  %v1475_v45 = vld [vmem:[#allocation5 + $0x158] sm:$0xf] }
  0x8c   :  { %1295 = vmatmul.msk.bf16.vlgmr.msra.gmra.mxu2 %vm137_vm2, %v2090_v13  ;;  %900 = vmatpush.bf16.msra.mxu3 %v1672_v12  ;;  %v1457_v12 = vld [vmem:[#allocation5 + $0x144] sm:$0xf0]  ;;  %v1476_v54 = vor.u32 %v1825_v46, %v1475_v45 }
  0x8d   :  { %926 = vmatpush.bf16.msra.mxu1 %v1484_v57  ;;  %868 = vmatpush.bf16.msra.mxu0 %v1300_v63  ;;  %v1325_v57 = vld [vmem:[#allocation5 + $0x3c] sm:$0xf0]  ;;  %v1520_v63 = vor.u32 %v1835_v58, %v1517_v60 }
  0x8e   :  { %939 = vmatpush.bf16.msra.mxu2 %v1580_v2  ;;  %v1328_v59 = vor.u32 %v1787_v56, %v1325_v57  ;;  %v1397_v2 = vld [vmem:[#allocation5 + $0xcc] sm:$0xf0]  ;;  %v1852_v56 = vld [vmem:[#allocation5 + $0x238] sm:$0xf0]  ;;  %v1463_v58 = vld [vmem:[#allocation5 + $0x140] sm:$0xf] }
  0x90   :  { %901 = vmatpush.bf16.msra.mxu3 %v1660_v25  ;;  %v1364_v25 = vor.u32 %v1796_v17, %v1361_v18  ;;  %v1493_v18 = vld [vmem:[#allocation5 + $0x18c] sm:$0xf0] }
  0x91   :  { %913 = vmatpush.bf16.msrb.mxu0 %v1388_v1  ;;  %927 = vmatpush.bf16.msra.mxu1 %v1472_v7  ;;  %v1805_v1 = vld [vmem:[#allocation5 + $0xc4] sm:$0xf]  ;;  %v1316_v7 = vor.u32 %v1784_v4, %v1313_v5  ;;  %v1571_v4 = vld [vmem:[#allocation5 + $0x218] sm:$0xf] }
  0x92   :  { %940 = vmatpush.bf16.msra.mxu2 %v1568_v15  ;;  %v1301_v15 = vld [vmem:[#allocation5 + $0xc] sm:$0xf0]  ;;  %v1849_v5 = vld [vmem:[#allocation5 + $0x220] sm:$0xf0] }
  0x94   :  { %902 = vmatpush.bf16.msra.mxu3 %v1648_v37  ;;  %v1436_v37 = vor.u32 %v1814_v33, %v1433_v34  ;;  %v1589_v33 = vld [vmem:[#allocation5 + $0x24c] sm:$0xf0] }
  0x95   :  { %914 = vmatpush.bf16.msrb.mxu0 %v1376_v14  ;;  %v1781_v14 = vld [vmem:[#allocation5 + $0x4] sm:$0xf]  ;;  %v1592_v34 = vor.u32 %v1853_v32, %v1589_v33 }
  0x96   :  { %941 = vmatpush.bf16.msra.mxu2 %v1556_v26  ;;  %v1304_v17 = vor.u32 %v1781_v14, %v1301_v15  ;;  %v1613_v26 = vld [vmem:[#allocation5 + $0x27c] sm:$0xf0]  ;;  %v1798_v14 = vld [vmem:[#allocation5 + $0x88] sm:$0xf0] }
  0x98   :  { %903 = vmatpush.bf16.msra.mxu3 %v1636_v52  ;;  %v1676_v52 = vor.u32 %v1874_v49, %v1673_v50  ;;  %v1391_v50 = vld [vmem:[#allocation5 + $0xb0] sm:$0xf] }
  0x99   :  { %915 = vmatpush.bf16.msrb.mxu0 %v1364_v25  ;;  %v1859_v25 = vld [vmem:[#allocation5 + $0x274] sm:$0xf] }
  0x9a   :  { %942 = vmatpush.bf16.msra.mxu2 %v1544_v36 }
  0x9b   :  { %1296 = vmatmul.msk.bf16.vlgmr.msrb.gmra.mxu3 %vm137_vm2, %v2090_v13  ;;  %v1460_v13 = vor.u32 %v1820_v11, %v1457_v12  ;;  %v1508_v11 = vor.u32 %v1832_v6, %v1505_v8  ;;  %v1652_v12 = vor.u32 %v1868_v9, %v1649_v10  ;;  %v1451_v6 = vld [vmem:[#allocation5 + $0x128] sm:$0xf] }
  0x9c   :  { %904 = vmatpush.bf16.msra.mxu3 %v1624_v3  ;;  %v1400_v3 = vor.u32 %v1805_v1, %v1397_v2  ;;  %v1801_v1 = vld [vmem:[#allocation5 + $0xa0] sm:$0xf0] }
  0x9d   :  { %928 = vmatpush.bf16.msra.mxu1 %v1460_v13  ;;  %916 = vmatpush.bf16.msrb.mxu0 %v1352_v35  ;;  %v1637_v13 = vld [vmem:[#allocation5 + $0x2ac] sm:$0xf0]  ;;  %v100_v35 = vperm.slane %v2103_v31, 1 }
  0x9e   :  { %943 = vmatpush.bf16.msra.mxu2 %v1532_v51  ;;  %v1640_v21 = vor.u32 %v1865_v19, %v1637_v13  ;;  %v1804_v51 = vld [vmem:[#allocation5 + $0xb8] sm:$0xf0] }
  0x9f   :  { %v1392_v61 = vor.u32 %v1804_v51, %v1391_v50  ;;  %v1816_v19 = vld [vmem:[#allocation5 + $0x118] sm:$0xf0]  ;;  %v1523_v50 = vld [vmem:[#allocation5 + $0x1b8] sm:$0xf] }
  0xa0   :  { %905 = vmatpush.bf16.msra.mxu3 %v1612_v16  ;;  %v1829_v16 = vld [vmem:[#allocation5 + $0x184] sm:$0xf] }
  0xa1   :  { %929 = vmatpush.bf16.msra.mxu1 %v1448_v30  ;;  %917 = vmatpush.bf16.msrb.mxu0 %v1340_v47  ;;  %v1496_v20 = vor.u32 %v1829_v16, %v1493_v18  ;;  %v1604_v30 = vor.u32 %v1856_v28, %v1601_v29  ;;  %v1559_v16 = vld [vmem:[#allocation5 + $0x200] sm:$0xf]  ;;  %v1439_v18 = vld [vmem:[#allocation5 + $0x110] sm:$0xf]  ;;  %v1813_v28 = vld [vmem:[#allocation5 + $0x100] sm:$0xf0] }
  0xa2   :  { %944 = vmatpush.bf16.msra.mxu2 %v1520_v63 }
  0xa4   :  { %906 = vmatpush.bf16.msra.mxu3 %v1600_v27  ;;  %v1616_v27 = vor.u32 %v1859_v25, %v1613_v26  ;;  %v1547_v25 = vld [vmem:[#allocation5 + $0x1e8] sm:$0xf]  ;;  %v1843_v26 = vld [vmem:[#allocation5 + $0x1f0] sm:$0xf0] }
  0xa5   :  { %930 = vmatpush.bf16.msra.mxu1 %v1436_v37  ;;  %918 = vmatpush.bf16.msrb.mxu0 %v1328_v59  ;;  %v1822_v59 = vld [vmem:[#allocation5 + $0x148] sm:$0xf0]  ;;  %v1548_v33 = vor.u32 %v1843_v26, %v1547_v25  ;;  %v1595_v26 = vld [vmem:[#allocation5 + $0x248] sm:$0xf] }
  0xa6   :  { %945 = vmatpush.bf16.msra.mxu2 %v1508_v11  ;;  %v1572_v11 = vor.u32 %v1849_v5, %v1571_v4  ;;  %v1655_v4 = vld [vmem:[#allocation5 + $0x2c0] sm:$0xf]  ;;  %v1870_v5 = vld [vmem:[#allocation5 + $0x2c8] sm:$0xf0] }
  0xa7   :  { %v1858_v25 = vld [vmem:[#allocation5 + $0x268] sm:$0xf0] }
  0xa8   :  { %907 = vmatpush.bf16.msra.mxu3 %v1588_v43  ;;  %v1488_v43 = vor.u32 %v1828_v39, %v1487_v38  ;;  %v1679_v38 = vld [vmem:[#allocation5 + $0x2f0] sm:$0xf]  ;;  %v1876_v39 = vld [vmem:[#allocation5 + $0x2f8] sm:$0xf0] }
  0xa9   :  { %931 = vmatpush.bf16.msra.mxu1 %v1424_v40  ;;  %919 = vmatpush.bf16.msrb.mxu0 %v1316_v7  ;;  %v1819_v7 = vld [vmem:[#allocation5 + $0x130] sm:$0xf0] }
  0xaa   :  { %946 = vmatpush.bf16.msra.mxu2 %v1496_v20  ;;  %v1452_v15 = vor.u32 %v1819_v7, %v1451_v6  ;;  %v102_v20 = vperm.slane %v2103_v31, 3  ;;  %v1535_v31 = vld [vmem:[#allocation5 + $0x1d0] sm:$0xf] }
  0xac   :  { %952 = vmatpush.bf16.msrb.mxu3 %v1676_v52 }
  0xad   :  { %932 = vmatpush.bf16.msra.mxu1 %v1412_v55  ;;  %920 = vmatpush.bf16.msrb.mxu0 %v1304_v17  ;;  %v1583_v55 = vld [vmem:[#allocation5 + $0x230] sm:$0xf]  ;;  %v1846_v17 = vld [vmem:[#allocation5 + $0x208] sm:$0xf0] }
  0xae   :  { %v1584_v63 = vor.u32 %v1852_v56, %v1583_v55  ;;  %v1403_v55 = vld [vmem:[#allocation5 + $0xc8] sm:$0xf]  ;;  %v1807_v56 = vld [vmem:[#allocation5 + $0xd0] sm:$0xf0] }
  0xb0   :  { %953 = vmatpush.bf16.msrb.mxu3 %v1664_v0  ;;  %v1379_v0 = vld [vmem:[#allocation5 + $0x98] sm:$0xf] }
  0xb1   :  { %933 = vmatpush.bf16.msra.mxu1 %v1400_v3  ;;  %v1464_v3 = vor.u32 %v1822_v59, %v1463_v58  ;;  %v1380_v9 = vor.u32 %v1801_v1, %v1379_v0  ;;  %v1511_v0 = vld [vmem:[#allocation5 + $0x1a0] sm:$0xf]  ;;  %v1404_v1 = vor.u32 %v1807_v56, %v1403_v55  ;;  %v1896_v56 = vld [vmem:[#allocation7 + $0x98] sm:$0xff] }
  0xb4   :  { %954 = vmatpush.bf16.msrb.mxu3 %v1652_v12  ;;  %v1367_v12 = vld [vmem:[#allocation5 + $0x80] sm:$0xf] }
  0xb5   :  { %v1368_v13 = vor.u32 %v1798_v14, %v1367_v12  ;;  %v1831_v12 = vld [vmem:[#allocation5 + $0x190] sm:$0xf0]  ;;  %v1643_v14 = vld [vmem:[#allocation5 + $0x2a8] sm:$0xf] }
  0xb8   :  { %955 = vmatpush.bf16.msrb.mxu3 %v1640_v21  ;;  %v1560_v21 = vor.u32 %v1846_v17, %v1559_v16 }
  0xbc   :  { %956 = vmatpush.bf16.msrb.mxu3 %v1628_v24  ;;  %v1440_v24 = vor.u32 %v1816_v19, %v1439_v18  ;;  %v1631_v19 = vld [vmem:[#allocation5 + $0x290] sm:$0xf] }
  0xc0   :  { %957 = vmatpush.bf16.msrb.mxu3 %v1616_v27  ;;  %v1427_v27 = vld [vmem:[#allocation5 + $0xf8] sm:$0xf] }
  0xc4   :  { %958 = vmatpush.bf16.msrb.mxu3 %v1604_v30  ;;  %v1356_v30 = vor.u32 %v1795_v23, %v1355_v22  ;;  %v1861_v22 = vld [vmem:[#allocation5 + $0x280] sm:$0xf0] }
  0xc8   :  { %959 = vmatpush.bf16.msrb.mxu3 %v1592_v34  ;;  %v1343_v34 = vld [vmem:[#allocation5 + $0x50] sm:$0xf] }
 0x108   :  { %v175_v36 = vpop.f32.mrf.mxu1 }
 0x109   :  { %v176_v37 = vadd.f32 %v175_v36, %v100_v35  ;;  %v1792_v35 = vld [vmem:[#allocation5 + $0x58] sm:$0xf0]  ;;  %v1428_v36 = vor.u32 %v1813_v28, %v1427_v27  ;;  %v1855_v27 = vld [vmem:[#allocation5 + $0x250] sm:$0xf0] }
 0x10a   :  { %v1596_v28 = vor.u32 %v1855_v27, %v1595_v26 }
 0x10b   :  { %v206_v40 = vmax.f32 %v176_v37, 0.0  ;;  %v1840_v37 = vld [vmem:[#allocation5 + $0x1d8] sm:$0xf0] }
 0x10c   :  { %v1536_v46 = vor.u32 %v1840_v37, %v1535_v31  ;;  %v1878_v31 = vld [vmem:[#allocation7 + $0x8] sm:$0xff]  ;;  %v1877_v37 = vld [vmem:[#allocation7] sm:$0xff] }
 0x10d   :  { %v2108_v44 = vpack.c.bf16 %v206_v40, %v206_v40 }
 0x10e   :  { %v162_v47 = vpop.f32.mrf.mxu3 }
 0x10f   :  { %v163_v48 = vadd.f32 %v162_v47, %v99_v41  ;;  %v188_v49 = vpop.f32.mrf.mxu2  ;;  %882 = vmatmul.bf16.vlgmr.msrb.gmra.mxu1 %v2108_v44  ;;  %v1415_v41 = vld [vmem:[#allocation5 + $0xe0] sm:$0xf]  ;;  %v1680_v47 = vor.u32 %v1876_v39, %v1679_v38 }
 0x110   :  { %v189_v52 = vadd.f32 %v188_v49, %v101_v42  ;;  %v177_v53 = vpop.f32.mrf.mxu1  ;;  %978 = vmatpush.bf16.msrb.mxu1 %v1488_v43  ;;  %v1810_v42 = vld [vmem:[#allocation5 + $0xe8] sm:$0xf0]  ;;  %v1344_v43 = vor.u32 %v1792_v35, %v1343_v34  ;;  %v1789_v49 = vld [vmem:[#allocation5 + $0x40] sm:$0xf0]  ;;  %v1879_v34 = vld [vmem:[#allocation7 + $0x10] sm:$0xff] }
 0x111   :  { %v205_v57 = vmax.f32 %v163_v48, 0.0  ;;  %v1331_v48 = vld [vmem:[#allocation5 + $0x38] sm:$0xf]  ;;  %v1416_v51 = vor.u32 %v1810_v42, %v1415_v41  ;;  %v1891_v35 = vld [vmem:[#allocation7 + $0x70] sm:$0xff]  ;;  %v1889_v38 = vld [vmem:[#allocation7 + $0x60] sm:$0xff] }
 0x112   :  { %v207_v60 = vmax.f32 %v189_v52, 0.0  ;;  %v1837_v52 = vld [vmem:[#allocation5 + $0x1c0] sm:$0xf0]  ;;  %v1667_v53 = vld [vmem:[#allocation5 + $0x2d8] sm:$0xf]  ;;  %v1332_v58 = vor.u32 %v1789_v49, %v1331_v48  ;;  %v1898_v48 = vld [vmem:[#allocation7 + $0xa8] sm:$0xff] }
 0x113   :  { %v2111_v62 = vpack.c.bf16 %v205_v57, %v205_v57  ;;  %v1524_v59 = vor.u32 %v1837_v52, %v1523_v50  ;;  %v1900_v41 = vld [vmem:[#allocation7 + $0xb8] sm:$0xff]  ;;  %v341_v50 = vld [vmem:[%s2143_s5] sm:$0x7]  ;;  %v1885_v52 = vld [vmem:[#allocation7 + $0x40] sm:$0xff] }
 0x114   :  { %v2113_v2 = vpack.c.bf16 %v207_v60, %v207_v60  ;;  %979 = vmatpush.bf16.msrb.mxu1 %v1476_v54  ;;  %v1873_v54 = vld [vmem:[#allocation5 + $0x2e0] sm:$0xf0]  ;;  %v343_v55 = vperm.slane %v341_v50, 0 }
 0x115   :  { %869 = vmatmul.bf16.vlgmr.msra.gmra.mxu0 %v2111_v62  ;;  %v1668_v60 = vor.u32 %v1873_v54, %v1667_v53  ;;  %v1897_v53 = vld [vmem:[#allocation7 + $0xa0] sm:$0xff] }
 0x116   :  { %895 = vmatmul.bf16.vlgmr.msrb.gmra.mxu2 %v2113_v2  ;;  %v164_v8 = vpop.f32.mrf.mxu3  ;;  %965 = vmatpush.bf16.msra.mxu0 %v1392_v61  ;;  %v1319_v61 = vld [vmem:[#allocation5 + $0x20] sm:$0xf] }
 0x117   :  { %v190_v10 = vpop.f32.mrf.mxu2  ;;  %991 = vmatpush.bf16.msrb.mxu2 %v1584_v63  ;;  %v1786_v63 = vld [vmem:[#allocation5 + $0x28] sm:$0xf0]  ;;  %v1656_v8 = vor.u32 %v1870_v5, %v1655_v4 }
 0x118   :  { %980 = vmatpush.bf16.msrb.mxu1 %v1464_v3  ;;  %v1834_v3 = vld [vmem:[#allocation5 + $0x1a8] sm:$0xf0]  ;;  %v1320_v6 = vor.u32 %v1786_v63, %v1319_v61  ;;  %v1783_v10 = vld [vmem:[#allocation5 + $0x10] sm:$0xf0] }
 0x119   :  { %v1512_v7 = vor.u32 %v1834_v3, %v1511_v0 }
 0x11a   :  { %966 = vmatpush.bf16.msra.mxu0 %v1380_v9  ;;  %v1307_v9 = vld [vmem:[#allocation5 + $0x8] sm:$0xf] }
 0x11b   :  { %992 = vmatpush.bf16.msrb.mxu2 %v1572_v11  ;;  %v1499_v11 = vld [vmem:[#allocation5 + $0x188] sm:$0xf]  ;;  %v1308_v16 = vor.u32 %v1783_v10, %v1307_v9  ;;  %v344_v9 = vperm.slane %v341_v50, 1 }
 0x11c   :  { %981 = vmatpush.bf16.msrb.mxu1 %v1452_v15  ;;  %v1867_v15 = vld [vmem:[#allocation5 + $0x2b0] sm:$0xf0]  ;;  %v1500_v17 = vor.u32 %v1831_v12, %v1499_v11 }
 0x11d   :  { %v1644_v18 = vor.u32 %v1867_v15, %v1643_v14 }
 0x11e   :  { %v201_v29 = vpop.f32.mrf.mxu3  ;;  %967 = vmatpush.bf16.msra.mxu0 %v1368_v13  ;;  %v1864_v13 = vld [vmem:[#allocation5 + $0x298] sm:$0xf0] }
 0x11f   :  { %v202_v32 = vadd.f32 %v201_v29, %v102_v20  ;;  %993 = vmatpush.bf16.msrb.mxu2 %v1560_v21  ;;  %934 = vmatmul.bf16.vlgmr.msra.gmra.mxu1 %v2108_v44  ;;  %v1632_v20 = vor.u32 %v1864_v13, %v1631_v19  ;;  %v1619_v21 = vld [vmem:[#allocation5 + $0x278] sm:$0xf] }
 0x120   :  { %982 = vmatpush.bf16.msrb.mxu1 %v1440_v24  ;;  %v1620_v23 = vor.u32 %v1861_v22, %v1619_v21  ;;  %v1607_v24 = vld [vmem:[#allocation5 + $0x260] sm:$0xf]  ;;  %v1884_v29 = vld [vmem:[#allocation7 + $0x38] sm:$0xff] }
 0x121   :  { %v208_v40 = vmax.f32 %v202_v32, 0.0  ;;  %v1880_v32 = vld [vmem:[#allocation7 + $0x18] sm:$0xff] }
 0x122   :  { %968 = vmatpush.bf16.msra.mxu0 %v1356_v30  ;;  %v1883_v30 = vld [vmem:[#allocation7 + $0x30] sm:$0xff] }
 0x123   :  { %v2119_v45 = vpack.c.bf16 %v208_v40, %v208_v40  ;;  %994 = vmatpush.bf16.msrb.mxu2 %v1548_v33  ;;  %v1892_v33 = vld [vmem:[#allocation7 + $0x78] sm:$0xff] }
 0x124   :  { %983 = vmatpush.bf16.msrb.mxu1 %v1428_v36  ;;  %v1890_v36 = vld [vmem:[#allocation7 + $0x68] sm:$0xff]  ;;  %v1888_v40 = vld [vmem:[#allocation7 + $0x58] sm:$0xff] }
 0x125   :  { %908 = vmatmul.bf16.vlgmr.msra.gmra.mxu3 %v2119_v45  ;;  %921 = vmatmul.bf16.vlgmr.msrb.gmra.mxu0 %v2111_v62 }
 0x126   :  { %947 = vmatmul.bf16.vlgmr.msra.gmra.mxu2 %v2113_v2  ;;  %v203_v57 = vpop.f32.mrf.mxu3  ;;  %969 = vmatpush.bf16.msra.mxu0 %v1344_v43  ;;  %v1887_v43 = vld [vmem:[#allocation7 + $0x50] sm:$0xff] }
 0x127   :  { %995 = vmatpush.bf16.msrb.mxu2 %v1536_v46  ;;  %1004 = vmatpush.bf16.msra.mxu3 %v1680_v47  ;;  %v1886_v47 = vld [vmem:[#allocation7 + $0x48] sm:$0xff] }
 0x128   :  { %984 = vmatpush.bf16.msrb.mxu1 %v1416_v51 }
 0x12a   :  { %970 = vmatpush.bf16.msra.mxu0 %v1332_v58 }
 0x12b   :  { %996 = vmatpush.bf16.msrb.mxu2 %v1524_v59  ;;  %1005 = vmatpush.bf16.msra.mxu3 %v1668_v60  ;;  %v1895_v59 = vld [vmem:[#allocation7 + $0x90] sm:$0xff] }
 0x12c   :  { %985 = vmatpush.bf16.msrb.mxu1 %v1404_v1  ;;  %v1894_v1 = vld [vmem:[#allocation7 + $0x88] sm:$0xff] }
 0x12e   :  { %971 = vmatpush.bf16.msra.mxu0 %v1320_v6 }
 0x12f   :  { %997 = vmatpush.bf16.msrb.mxu2 %v1512_v7  ;;  %1006 = vmatpush.bf16.msra.mxu3 %v1656_v8  ;;  %v1893_v8 = vld [vmem:[#allocation7 + $0x80] sm:$0xff] }
 0x130   :  { %986 = vmatmul.bf16.vlgmr.msrb.gmra.mxu1 %v2108_v44  ;;  %v1608_v44 = vor.u32 %v1858_v25, %v1607_v24  ;;  %v345_v25 = vperm.slane %v341_v50, 2 }
 0x131   :  { %1232 = vmatpush.bf16.msra.mxu1 %v1892_v33 }
 0x132   :  { %972 = vmatpush.bf16.msra.mxu0 %v1308_v16 }
 0x133   :  { %998 = vmatpush.bf16.msrb.mxu2 %v1500_v17  ;;  %1007 = vmatpush.bf16.msra.mxu3 %v1644_v18 }
 0x135   :  { %960 = vmatmul.bf16.vlgmr.msrb.gmra.mxu3 %v2119_v45  ;;  %973 = vmatmul.bf16.vlgmr.msra.gmra.mxu0 %v2111_v62  ;;  %v1882_v62 = vld [vmem:[#allocation7 + $0x28] sm:$0xff] }
 0x136   :  { %999 = vmatmul.bf16.vlgmr.msrb.gmra.mxu2 %v2113_v2  ;;  %1219 = vmatpush.bf16.msrb.mxu0 %v1884_v29  ;;  %v1881_v2 = vld [vmem:[#allocation7 + $0x20] sm:$0xff] }
 0x137   :  { %1008 = vmatpush.bf16.msra.mxu3 %v1632_v20  ;;  %1233 = vmatpush.bf16.msra.mxu1 %v1891_v35 }
 0x138   :  { %1245 = vmatpush.bf16.msra.mxu2 %v1900_v41 }
 0x13a   :  { %1220 = vmatpush.bf16.msrb.mxu0 %v1883_v30 }
 0x13b   :  { %1009 = vmatpush.bf16.msra.mxu3 %v1620_v23  ;;  %1234 = vmatpush.bf16.msra.mxu1 %v1890_v36 }
 0x13e   :  { %1221 = vmatpush.bf16.msrb.mxu0 %v1882_v62 }
 0x13f   :  { %1010 = vmatpush.bf16.msra.mxu3 %v1608_v44  ;;  %1235 = vmatpush.bf16.msra.mxu1 %v1889_v38 }
 0x142   :  { %1222 = vmatpush.bf16.msrb.mxu0 %v1881_v2 }
 0x143   :  { %1011 = vmatpush.bf16.msra.mxu3 %v1596_v28  ;;  %1236 = vmatpush.bf16.msra.mxu1 %v1888_v40 }
 0x146   :  { %1012 = vmatmul.bf16.vlgmr.msra.gmra.mxu3 %v2119_v45  ;;  %1223 = vmatpush.bf16.msrb.mxu0 %v1880_v32  ;;  %v1899_v45 = vld [vmem:[#allocation7 + $0xb0] sm:$0xff] }
 0x147   :  { %1237 = vmatpush.bf16.msra.mxu1 %v1887_v43  ;;  %1246 = vmatpush.bf16.msra.mxu2 %v1899_v45 }
 0x14a   :  { %1224 = vmatpush.bf16.msrb.mxu0 %v1879_v34 }
 0x14b   :  { %1238 = vmatpush.bf16.msra.mxu1 %v1886_v47  ;;  %1247 = vmatpush.bf16.msra.mxu2 %v1898_v48 }
 0x14e   :  { %1225 = vmatpush.bf16.msrb.mxu0 %v1878_v31 }
 0x14f   :  { %1239 = vmatpush.bf16.msra.mxu1 %v1885_v52  ;;  %1248 = vmatpush.bf16.msra.mxu2 %v1897_v53 }
 0x152   :  { %1226 = vmatpush.bf16.msrb.mxu0 %v1877_v37  ;;  %v1911_v37 = vld [vmem:[%s2145_s7] ss:$0 sm:$0xff] }
 0x153   :  { %1249 = vmatpush.bf16.msra.mxu2 %v1896_v56 }
 0x157   :  { %1250 = vmatpush.bf16.msra.mxu2 %v1895_v59 }
 0x15b   :  { %1251 = vmatpush.bf16.msra.mxu2 %v1894_v1 }
 0x15f   :  { %1252 = vmatpush.bf16.msra.mxu2 %v1893_v8 }
 0x18c   :  { %v883_v39 = vpop.f32.mrf.mxu1 }
 0x192   :  { %v870_v42 = vpop.f32.mrf.mxu0 }
 0x193   :  { %v871_v57 = vadd.f32 %v870_v42, %v343_v55 }
 0x194   :  { %v885_v46 = vpop.f32.mrf.mxu1 }
 0x195   :  { %v884_v63 = vadd.f32 %v883_v39, %v871_v57 }
 0x199   :  { %v896_v49 = vpop.f32.mrf.mxu2 }
 0x19a   :  { %v872_v51 = vpop.f32.mrf.mxu0  ;;  %v897_v0 = vadd.f32 %v896_v49, %v884_v63 }
 0x19c   :  { %v935_v54 = vpop.f32.mrf.mxu1 }
 0x1a1   :  { %v898_v58 = vpop.f32.mrf.mxu2 }
 0x1a2   :  { %v922_v60 = vpop.f32.mrf.mxu0 }
 0x1a3   :  { %v923_v14 = vadd.f32 %v922_v60, %v344_v9 }
 0x1a4   :  { %v937_v61 = vpop.f32.mrf.mxu1 }
 0x1a5   :  { %v936_v17 = vadd.f32 %v935_v54, %v923_v14 }
 0x1a8   :  { %v909_v3 = vpop.f32.mrf.mxu3 }
 0x1a9   :  { %v910_v4 = vadd.f32 %v909_v3, %v897_v0  ;;  %v948_v5 = vpop.f32.mrf.mxu2 }
 0x1aa   :  { %v924_v6 = vpop.f32.mrf.mxu0  ;;  %v949_v19 = vadd.f32 %v948_v5, %v936_v17 }
 0x1ab   :  { %v1017_v7 = vmax.f32 %v910_v4, 0.0 }
 0x1ad   :  { %v1020_v10 = vpack.c.bf16 %v1017_v7, %v1017_v7  ;;  %v987_v11 = vpop.f32.mrf.mxu1 }
 0x1af   :  { %1227 = vmatmul.bf16.vlgmr.msrb.gmra.mxu0 %v1020_v10 }
 0x1b0   :  { %v911_v12 = vpop.f32.mrf.mxu3 }
 0x1b1   :  { %v950_v15 = vpop.f32.mrf.mxu2 }
 0x1b2   :  { %v974_v16 = vpop.f32.mrf.mxu0 }
 0x1b3   :  { %v975_v27 = vadd.f32 %v974_v16, %v345_v25 }
 0x1b5   :  { %v989_v18 = vpop.f32.mrf.mxu1  ;;  %v988_v28 = vadd.f32 %v987_v11, %v975_v27 }
 0x1b8   :  { %v961_v13 = vpop.f32.mrf.mxu3 }
 0x1b9   :  { %v962_v20 = vadd.f32 %v961_v13, %v949_v19  ;;  %v1000_v21 = vpop.f32.mrf.mxu2 }
 0x1ba   :  { %v976_v22 = vpop.f32.mrf.mxu0  ;;  %v1001_v29 = vadd.f32 %v1000_v21, %v988_v28 }
 0x1bb   :  { %v1018_v23 = vmax.f32 %v962_v20, 0.0 }
 0x1bd   :  { %v1021_v24 = vpack.c.bf16 %v1018_v23, %v1018_v23 }
 0x1bf   :  { %1240 = vmatmul.bf16.vlgmr.msra.gmra.mxu1 %v1021_v24 }
 0x1c0   :  { %v963_v44 = vpop.f32.mrf.mxu3 }
 0x1c1   :  { %v1002_v26 = vpop.f32.mrf.mxu2 }
 0x1c9   :  { %v1013_v30 = vpop.f32.mrf.mxu3 }
 0x1ca   :  { %v1014_v62 = vadd.f32 %v1013_v30, %v1001_v29 }
 0x1cc   :  { %v1019_v2 = vmax.f32 %v1014_v62, 0.0 }
 0x1ce   :  { %v1022_v32 = vpack.c.bf16 %v1019_v2, %v1019_v2 }
 0x1d0   :  { %1253 = vmatmul.bf16.vlgmr.msra.gmra.mxu2 %v1022_v32 }
 0x1d1   :  { %v1015_v33 = vpop.f32.mrf.mxu3 }
 0x22c   :  { %v1228_v34 = vpop.f32.mrf.mxu0 }
 0x22d   :  { %v1229_v38 = vadd.f32 %v1911_v37, %v1228_v34 }
 0x234   :  { %v1230_v35 = vpop.f32.mrf.mxu0 }
 0x23c   :  { %v1241_v31 = vpop.f32.mrf.mxu1 }
 0x23d   :  { %v1242_v39 = vadd.f32 %v1241_v31, %v1229_v38 }
 0x244   :  { %v1243_v36 = vpop.f32.mrf.mxu1 }
 0x253   :  { %v1254_v40 = vpop.f32.mrf.mxu2 }
 0x254   :  { %v1255_v41 = vadd.f32 %v1254_v40, %v1242_v39 }
 0x256   :  { %1258 = vst [vmem:[#allocation8] sm:$0xff] %v1255_v41 }
 0x257   :  { %1269 = dma.vmem_to_hbm [thread:$0]  %s1265_s30, 128, %s1267_s11, [#allocation4]  }
 0x25b   :  { %v1256_v42 = vpop.f32.mrf.mxu2 }
 0x25c   :  { %2012 = dma.done.wait [#allocation4], 128  }
 0x25d   :  { %2013 = vsyncadd [#allocation4], 4294967168 }
 0x25e   :  { %1274 = vsyncpa [#allocation3], 1 }
 0x25f   :  { %1275 = vsyncpa [#allocation6], 1 }
 0x260   :  { %1276 = vsyncpa [#allocation4], 1 }

</bundles_post_ra>
